<compile_context>
chip_gen: v7x
topology: tpu7x:2x2x1
jax: 0.10.0
libtpu: 0.0.40
codegen_flags: <defaults>
</compile_context>

<pallas_src>
import functools

import jax
import jax.numpy as jnp
from jax import lax
from jax.experimental import pallas as pl
from jax.experimental.pallas import tpu as pltpu

_LANE = 128
_DMA_RING = 16                         # max row DMAs in flight per grid step
_TILE_VMEM_BUDGET = 12 * 1024 * 1024   # per output buffer; x2 when double-buffered


def _emb_gather_kernel(ts, seq_len, depth, ids_ref, table_ref, out_ref, sems):
    """Gather up to `ts` embedding rows for grid step t into the output tile.

    ids_ref  : SMEM (S_pad,) int32 token ids (scalar prefetch)
    table_ref: HBM  (V, H_lanes) embedding table (memory_space=pl.ANY, no auto-DMA)
    out_ref  : VMEM (ts, H_lanes) output tile for this grid step
    sems     : DMA semaphore ring, shape (depth,)
    """
    base = pl.program_id(0) * ts

    def row_copy(j):
        # Single descriptor builder shared by start() and wait(): src/dst/sem are
        # guaranteed identical (no fake row-0 wait source).
        tok = ids_ref[base + j]
        return pltpu.make_async_copy(
            table_ref.at[pl.ds(tok, 1), :],
            out_ref.at[pl.ds(j, 1), :],
            sems.at[j & (depth - 1)],      # depth is always a power of two (8 or 16)
        )

    def in_range(j):
        return base + j < seq_len          # skip padded tail rows

    # Prime the ring: up to `depth` row DMAs in flight.
    def prime(j, carry):
        @pl.when(in_range(j))
        def _():
            row_copy(j).start()
        return carry

    lax.fori_loop(0, depth, prime, 0, unroll=True)

    # Steady state: retire row j, then launch row j + depth on the freed semaphore.
    def body(j, carry):
        @pl.when(in_range(j))
        def _():
            row_copy(j).wait()

        nxt = j + depth

        @pl.when(jnp.logical_and(nxt < ts, in_range(nxt)))
        def _():
            row_copy(nxt).start()

        return carry

    lax.fori_loop(0, ts, body, 0, unroll=8)


def enriched_embedding(input_ids: jax.Array, emb_table: jax.Array,
                       *, tokens_per_block: int = 256) -> jax.Array:
    """Pallas implementation of EnrichedEmbedding.forward (embedding lookup).

    input_ids : (1, S) integer token ids (batch must be 1, as in the module).
    emb_table : (V, H) embedding weight.
    returns   : (1, S, H) hidden_states = emb_table[input_ids].
    """
    assert input_ids.shape[0] == 1, "Batch size > 1 not supported yet"
    b, s = input_ids.shape
    v, h = emb_table.shape
    out_dtype = emb_table.dtype

    # Clamp ids -> no out-of-bounds DMA source.
    ids = jnp.clip(input_ids.reshape(-1).astype(jnp.int32), 0, v - 1)

    # Lane-dense rows: pad the embedding dim to a multiple of 128.
    h_pad = pl.cdiv(h, _LANE) * _LANE
    table = emb_table
    if h_pad != h:
        table = jnp.pad(table, ((0, 0), (0, h_pad - h)))

    # Pack sub-32-bit rows into uint32 so each row DMA is a dense 32-bit transfer.
    itemsize = table.dtype.itemsize
    packed = itemsize < 4
    if packed:
        pack = 4 // itemsize
        table = jax.lax.bitcast_convert_type(
            table.reshape(v, h_pad // pack, pack), jnp.uint32)
    h_lanes = table.shape[-1]
    row_bytes = h_lanes * table.dtype.itemsize

    # Token-tile size: big enough to amortize per-grid-step overhead, small enough
    # that the double-buffered output tile fits the v7x-safe VMEM budget.
    ts = min(tokens_per_block, max(8, _TILE_VMEM_BUDGET // row_bytes))
    ts = min(ts, s + (-s) % 8)           # never larger than the 8-rounded sequence
    ts = max(8, (ts // 8) * 8)           # (8, 128) tiling rule on the sublane dim

    s_pad = pl.cdiv(s, ts) * ts
    if s_pad != s:
        ids = jnp.pad(ids, (0, s_pad - s))

    depth = min(_DMA_RING, ts)           # ts is a multiple of 8 -> depth in {8, 16}

    out = pl.pallas_call(
        functools.partial(_emb_gather_kernel, ts, s, depth),
        out_shape=jax.ShapeDtypeStruct((s_pad, h_lanes), table.dtype),
        grid_spec=pltpu.PrefetchScalarGridSpec(
            num_scalar_prefetch=1,                           # ids -> SMEM
            grid=(s_pad // ts,),
            in_specs=[pl.BlockSpec(memory_space=pl.ANY)],    # table stays in HBM
            out_specs=pl.BlockSpec((ts, h_lanes), lambda t, ids: (t, 0)),
            scratch_shapes=[pltpu.SemaphoreType.DMA((depth,))],
        ),
        compiler_params=pltpu.CompilerParams(
            # On v7x, pltpu.CORE_PARALLEL on this axis would double DMA-descriptor
            # issue throughput; "parallel" is the portable default (v5e/v6e = 1 TC).
            dimension_semantics=("parallel",),
            vmem_limit_bytes=32 * 1024 * 1024,
        ),
        cost_estimate=pl.CostEstimate(
            flops=0, transcendentals=0, bytes_accessed=2 * s * row_bytes),
    )(ids, table)

    hs = out[:s]
    if packed:
        hs = jax.lax.bitcast_convert_type(hs, out_dtype).reshape(s, h_pad)
    if h_pad != h:
        hs = hs[:, :h]
    return hs.reshape(b, s, h)


if __name__ == "__main__":
    key = jax.random.PRNGKey(0)
    k_ids, k_tab = jax.random.split(key)

    # Small shapes consistent with the module: batch must be 1 (asserted in forward).
    batch, seq, hidden, vocab = 1, 8, 32, 64
    emb_table = jax.random.normal(k_tab, (vocab, hidden), dtype=jnp.float32)
    input_ids = jax.random.randint(k_ids, (batch, seq), 0, vocab, dtype=jnp.int32)

    # fp32 path.
    y = enriched_embedding(input_ids, emb_table)
    jax.block_until_ready(y)
    ref = emb_table[input_ids]
    assert y.shape == (batch, seq, hidden) and y.dtype == emb_table.dtype
    assert bool(jnp.all(y == ref))

    # bf16 path (packed uint32 row DMAs).
    emb_bf16 = emb_table.astype(jnp.bfloat16)
    y16 = enriched_embedding(input_ids, emb_bf16)
    jax.block_until_ready(y16)
    assert y16.shape == (batch, seq, hidden) and y16.dtype == jnp.bfloat16
    assert bool(jnp.all(y16 == emb_bf16[input_ids]))

    # Multi-tile grid with ragged tail (exercises the pl.when tail guard + DMA ring).
    seq2 = 40
    ids2 = jax.random.randint(k_ids, (1, seq2), 0, vocab, dtype=jnp.int32)
    y2 = enriched_embedding(ids2, emb_table, tokens_per_block=16)
    jax.block_until_ready(y2)
    assert bool(jnp.all(y2 == emb_table[ids2]))

    print("KERNEL_OK")
</pallas_src>

<mosaic_0001>
module attributes {stable_mosaic.version = 11 : i64} {
  func.func @_emb_gather_kernel(%arg0: i32, %arg1: memref<8xi32, #tpu.memory_space<smem>>, %arg2: memref<64x128xf32, #tpu.memory_space<any>>, %arg3: memref<8x128xf32, #tpu.memory_space<vmem>>, %arg4: memref<8x!tpu.dma_semaphore, #tpu.memory_space<semaphore_mem>>) attributes {dimension_semantics = [#tpu.dimension_semantics<parallel>], iteration_bounds = array<i64: 1>, scalar_prefetch = 1 : i64, scratch_operands = 1 : i64, tpu.core_type = #tpu.core_type<tc>, window_params = [{}, {transform_indices = @transform_1, window_bounds = array<i64: 8, 128>}]} {
    %c8_i32 = arith.constant 8 : i32
    %0 = arith.muli %arg0, %c8_i32 : i32
    %c0_i32 = arith.constant 0 : i32
    %1 = arith.addi %0, %c0_i32 : i32
    %c8_i32_0 = arith.constant 8 : i32
    %2 = arith.cmpi slt, %1, %c8_i32_0 : i32
    %3 = arith.extui %2 : i1 to i32
    %c0_i32_1 = arith.constant 0 : i32
    %4 = arith.cmpi ne, %3, %c0_i32_1 : i32
    scf.if %4 {
      %121 = arith.addi %0, %c0_i32 : i32
      %122 = arith.index_cast %121 : i32 to index
      %123 = memref.load %arg1[%122] : memref<8xi32, #tpu.memory_space<smem>>
      %c7_i32_74 = arith.constant 7 : i32
      %124 = arith.andi %c0_i32, %c7_i32_74 : i32
      %c0_i32_75 = arith.constant 0 : i32
      %125 = tpu.memref_slice %arg2[%123, %c0_i32_75] : memref<64x128xf32, #tpu.memory_space<any>> -> memref<1x128xf32, #tpu.memory_space<any>>
      %c0_i32_76 = arith.constant 0 : i32
      %126 = tpu.memref_slice %arg3[%c0_i32, %c0_i32_76] : memref<8x128xf32, #tpu.memory_space<vmem>> -> memref<1x128xf32, #tpu.memory_space<vmem>>
      %127 = tpu.memref_slice %arg4[%124] : memref<8x!tpu.dma_semaphore, #tpu.memory_space<semaphore_mem>> -> memref<1x!tpu.dma_semaphore, #tpu.memory_space<semaphore_mem>>
      %128 = tpu.memref_squeeze %127 : memref<1x!tpu.dma_semaphore, #tpu.memory_space<semaphore_mem>> -> memref<!tpu.dma_semaphore, #tpu.memory_space<semaphore_mem>>
      tpu.enqueue_dma source(%125 : memref<1x128xf32, #tpu.memory_space<any>>) target(%126 : memref<1x128xf32, #tpu.memory_space<vmem>>) target_semaphore(%128 : memref<!tpu.dma_semaphore, #tpu.memory_space<semaphore_mem>>)
    } else {
    }
    %c1_i32 = arith.constant 1 : i32
    %5 = arith.addi %0, %c1_i32 : i32
    %c8_i32_2 = arith.constant 8 : i32
    %6 = arith.cmpi slt, %5, %c8_i32_2 : i32
    %7 = arith.extui %6 : i1 to i32
    %c0_i32_3 = arith.constant 0 : i32
    %8 = arith.cmpi ne, %7, %c0_i32_3 : i32
    scf.if %8 {
      %121 = arith.addi %0, %c1_i32 : i32
      %122 = arith.index_cast %121 : i32 to index
      %123 = memref.load %arg1[%122] : memref<8xi32, #tpu.memory_space<smem>>
      %c7_i32_74 = arith.constant 7 : i32
      %124 = arith.andi %c1_i32, %c7_i32_74 : i32
      %c0_i32_75 = arith.constant 0 : i32
      %125 = tpu.memref_slice %arg2[%123, %c0_i32_75] : memref<64x128xf32, #tpu.memory_space<any>> -> memref<1x128xf32, #tpu.memory_space<any>>
      %c0_i32_76 = arith.constant 0 : i32
      %126 = tpu.memref_slice %arg3[%c1_i32, %c0_i32_76] : memref<8x128xf32, #tpu.memory_space<vmem>> -> memref<1x128xf32, #tpu.memory_space<vmem>>
      %127 = tpu.memref_slice %arg4[%124] : memref<8x!tpu.dma_semaphore, #tpu.memory_space<semaphore_mem>> -> memref<1x!tpu.dma_semaphore, #tpu.memory_space<semaphore_mem>>
      %128 = tpu.memref_squeeze %127 : memref<1x!tpu.dma_semaphore, #tpu.memory_space<semaphore_mem>> -> memref<!tpu.dma_semaphore, #tpu.memory_space<semaphore_mem>>
      tpu.enqueue_dma source(%125 : memref<1x128xf32, #tpu.memory_space<any>>) target(%126 : memref<1x128xf32, #tpu.memory_space<vmem>>) target_semaphore(%128 : memref<!tpu.dma_semaphore, #tpu.memory_space<semaphore_mem>>)
    } else {
    }
    %c2_i32 = arith.constant 2 : i32
    %9 = arith.addi %0, %c2_i32 : i32
    %c8_i32_4 = arith.constant 8 : i32
    %10 = arith.cmpi slt, %9, %c8_i32_4 : i32
    %11 = arith.extui %10 : i1 to i32
    %c0_i32_5 = arith.constant 0 : i32
    %12 = arith.cmpi ne, %11, %c0_i32_5 : i32
    scf.if %12 {
      %121 = arith.addi %0, %c2_i32 : i32
      %122 = arith.index_cast %121 : i32 to index
      %123 = memref.load %arg1[%122] : memref<8xi32, #tpu.memory_space<smem>>
      %c7_i32_74 = arith.constant 7 : i32
      %124 = arith.andi %c2_i32, %c7_i32_74 : i32
      %c0_i32_75 = arith.constant 0 : i32
      %125 = tpu.memref_slice %arg2[%123, %c0_i32_75] : memref<64x128xf32, #tpu.memory_space<any>> -> memref<1x128xf32, #tpu.memory_space<any>>
      %c0_i32_76 = arith.constant 0 : i32
      %126 = tpu.memref_slice %arg3[%c2_i32, %c0_i32_76] : memref<8x128xf32, #tpu.memory_space<vmem>> -> memref<1x128xf32, #tpu.memory_space<vmem>>
      %127 = tpu.memref_slice %arg4[%124] : memref<8x!tpu.dma_semaphore, #tpu.memory_space<semaphore_mem>> -> memref<1x!tpu.dma_semaphore, #tpu.memory_space<semaphore_mem>>
      %128 = tpu.memref_squeeze %127 : memref<1x!tpu.dma_semaphore, #tpu.memory_space<semaphore_mem>> -> memref<!tpu.dma_semaphore, #tpu.memory_space<semaphore_mem>>
      tpu.enqueue_dma source(%125 : memref<1x128xf32, #tpu.memory_space<any>>) target(%126 : memref<1x128xf32, #tpu.memory_space<vmem>>) target_semaphore(%128 : memref<!tpu.dma_semaphore, #tpu.memory_space<semaphore_mem>>)
    } else {
    }
    %c3_i32 = arith.constant 3 : i32
    %13 = arith.addi %0, %c3_i32 : i32
    %c8_i32_6 = arith.constant 8 : i32
    %14 = arith.cmpi slt, %13, %c8_i32_6 : i32
    %15 = arith.extui %14 : i1 to i32
    %c0_i32_7 = arith.constant 0 : i32
    %16 = arith.cmpi ne, %15, %c0_i32_7 : i32
    scf.if %16 {
      %121 = arith.addi %0, %c3_i32 : i32
      %122 = arith.index_cast %121 : i32 to index
      %123 = memref.load %arg1[%122] : memref<8xi32, #tpu.memory_space<smem>>
      %c7_i32_74 = arith.constant 7 : i32
      %124 = arith.andi %c3_i32, %c7_i32_74 : i32
      %c0_i32_75 = arith.constant 0 : i32
      %125 = tpu.memref_slice %arg2[%123, %c0_i32_75] : memref<64x128xf32, #tpu.memory_space<any>> -> memref<1x128xf32, #tpu.memory_space<any>>
      %c0_i32_76 = arith.constant 0 : i32
      %126 = tpu.memref_slice %arg3[%c3_i32, %c0_i32_76] : memref<8x128xf32, #tpu.memory_space<vmem>> -> memref<1x128xf32, #tpu.memory_space<vmem>>
      %127 = tpu.memref_slice %arg4[%124] : memref<8x!tpu.dma_semaphore, #tpu.memory_space<semaphore_mem>> -> memref<1x!tpu.dma_semaphore, #tpu.memory_space<semaphore_mem>>
      %128 = tpu.memref_squeeze %127 : memref<1x!tpu.dma_semaphore, #tpu.memory_space<semaphore_mem>> -> memref<!tpu.dma_semaphore, #tpu.memory_space<semaphore_mem>>
      tpu.enqueue_dma source(%125 : memref<1x128xf32, #tpu.memory_space<any>>) target(%126 : memref<1x128xf32, #tpu.memory_space<vmem>>) target_semaphore(%128 : memref<!tpu.dma_semaphore, #tpu.memory_space<semaphore_mem>>)
    } else {
    }
    %c4_i32 = arith.constant 4 : i32
    %17 = arith.addi %0, %c4_i32 : i32
    %c8_i32_8 = arith.constant 8 : i32
    %18 = arith.cmpi slt, %17, %c8_i32_8 : i32
    %19 = arith.extui %18 : i1 to i32
    %c0_i32_9 = arith.constant 0 : i32
    %20 = arith.cmpi ne, %19, %c0_i32_9 : i32
    scf.if %20 {
      %121 = arith.addi %0, %c4_i32 : i32
      %122 = arith.index_cast %121 : i32 to index
      %123 = memref.load %arg1[%122] : memref<8xi32, #tpu.memory_space<smem>>
      %c7_i32_74 = arith.constant 7 : i32
      %124 = arith.andi %c4_i32, %c7_i32_74 : i32
      %c0_i32_75 = arith.constant 0 : i32
      %125 = tpu.memref_slice %arg2[%123, %c0_i32_75] : memref<64x128xf32, #tpu.memory_space<any>> -> memref<1x128xf32, #tpu.memory_space<any>>
      %c0_i32_76 = arith.constant 0 : i32
      %126 = tpu.memref_slice %arg3[%c4_i32, %c0_i32_76] : memref<8x128xf32, #tpu.memory_space<vmem>> -> memref<1x128xf32, #tpu.memory_space<vmem>>
      %127 = tpu.memref_slice %arg4[%124] : memref<8x!tpu.dma_semaphore, #tpu.memory_space<semaphore_mem>> -> memref<1x!tpu.dma_semaphore, #tpu.memory_space<semaphore_mem>>
      %128 = tpu.memref_squeeze %127 : memref<1x!tpu.dma_semaphore, #tpu.memory_space<semaphore_mem>> -> memref<!tpu.dma_semaphore, #tpu.memory_space<semaphore_mem>>
      tpu.enqueue_dma source(%125 : memref<1x128xf32, #tpu.memory_space<any>>) target(%126 : memref<1x128xf32, #tpu.memory_space<vmem>>) target_semaphore(%128 : memref<!tpu.dma_semaphore, #tpu.memory_space<semaphore_mem>>)
    } else {
    }
    %c5_i32 = arith.constant 5 : i32
    %21 = arith.addi %0, %c5_i32 : i32
    %c8_i32_10 = arith.constant 8 : i32
    %22 = arith.cmpi slt, %21, %c8_i32_10 : i32
    %23 = arith.extui %22 : i1 to i32
    %c0_i32_11 = arith.constant 0 : i32
    %24 = arith.cmpi ne, %23, %c0_i32_11 : i32
    scf.if %24 {
      %121 = arith.addi %0, %c5_i32 : i32
      %122 = arith.index_cast %121 : i32 to index
      %123 = memref.load %arg1[%122] : memref<8xi32, #tpu.memory_space<smem>>
      %c7_i32_74 = arith.constant 7 : i32
      %124 = arith.andi %c5_i32, %c7_i32_74 : i32
      %c0_i32_75 = arith.constant 0 : i32
      %125 = tpu.memref_slice %arg2[%123, %c0_i32_75] : memref<64x128xf32, #tpu.memory_space<any>> -> memref<1x128xf32, #tpu.memory_space<any>>
      %c0_i32_76 = arith.constant 0 : i32
      %126 = tpu.memref_slice %arg3[%c5_i32, %c0_i32_76] : memref<8x128xf32, #tpu.memory_space<vmem>> -> memref<1x128xf32, #tpu.memory_space<vmem>>
      %127 = tpu.memref_slice %arg4[%124] : memref<8x!tpu.dma_semaphore, #tpu.memory_space<semaphore_mem>> -> memref<1x!tpu.dma_semaphore, #tpu.memory_space<semaphore_mem>>
      %128 = tpu.memref_squeeze %127 : memref<1x!tpu.dma_semaphore, #tpu.memory_space<semaphore_mem>> -> memref<!tpu.dma_semaphore, #tpu.memory_space<semaphore_mem>>
      tpu.enqueue_dma source(%125 : memref<1x128xf32, #tpu.memory_space<any>>) target(%126 : memref<1x128xf32, #tpu.memory_space<vmem>>) target_semaphore(%128 : memref<!tpu.dma_semaphore, #tpu.memory_space<semaphore_mem>>)
    } else {
    }
    %c6_i32 = arith.constant 6 : i32
    %25 = arith.addi %0, %c6_i32 : i32
    %c8_i32_12 = arith.constant 8 : i32
    %26 = arith.cmpi slt, %25, %c8_i32_12 : i32
    %27 = arith.extui %26 : i1 to i32
    %c0_i32_13 = arith.constant 0 : i32
    %28 = arith.cmpi ne, %27, %c0_i32_13 : i32
    scf.if %28 {
      %121 = arith.addi %0, %c6_i32 : i32
      %122 = arith.index_cast %121 : i32 to index
      %123 = memref.load %arg1[%122] : memref<8xi32, #tpu.memory_space<smem>>
      %c7_i32_74 = arith.constant 7 : i32
      %124 = arith.andi %c6_i32, %c7_i32_74 : i32
      %c0_i32_75 = arith.constant 0 : i32
      %125 = tpu.memref_slice %arg2[%123, %c0_i32_75] : memref<64x128xf32, #tpu.memory_space<any>> -> memref<1x128xf32, #tpu.memory_space<any>>
      %c0_i32_76 = arith.constant 0 : i32
      %126 = tpu.memref_slice %arg3[%c6_i32, %c0_i32_76] : memref<8x128xf32, #tpu.memory_space<vmem>> -> memref<1x128xf32, #tpu.memory_space<vmem>>
      %127 = tpu.memref_slice %arg4[%124] : memref<8x!tpu.dma_semaphore, #tpu.memory_space<semaphore_mem>> -> memref<1x!tpu.dma_semaphore, #tpu.memory_space<semaphore_mem>>
      %128 = tpu.memref_squeeze %127 : memref<1x!tpu.dma_semaphore, #tpu.memory_space<semaphore_mem>> -> memref<!tpu.dma_semaphore, #tpu.memory_space<semaphore_mem>>
      tpu.enqueue_dma source(%125 : memref<1x128xf32, #tpu.memory_space<any>>) target(%126 : memref<1x128xf32, #tpu.memory_space<vmem>>) target_semaphore(%128 : memref<!tpu.dma_semaphore, #tpu.memory_space<semaphore_mem>>)
    } else {
    }
    %c7_i32 = arith.constant 7 : i32
    %29 = arith.addi %0, %c7_i32 : i32
    %c8_i32_14 = arith.constant 8 : i32
    %30 = arith.cmpi slt, %29, %c8_i32_14 : i32
    %31 = arith.extui %30 : i1 to i32
    %c0_i32_15 = arith.constant 0 : i32
    %32 = arith.cmpi ne, %31, %c0_i32_15 : i32
    scf.if %32 {
      %121 = arith.addi %0, %c7_i32 : i32
      %122 = arith.index_cast %121 : i32 to index
      %123 = memref.load %arg1[%122] : memref<8xi32, #tpu.memory_space<smem>>
      %c7_i32_74 = arith.constant 7 : i32
      %124 = arith.andi %c7_i32, %c7_i32_74 : i32
      %c0_i32_75 = arith.constant 0 : i32
      %125 = tpu.memref_slice %arg2[%123, %c0_i32_75] : memref<64x128xf32, #tpu.memory_space<any>> -> memref<1x128xf32, #tpu.memory_space<any>>
      %c0_i32_76 = arith.constant 0 : i32
      %126 = tpu.memref_slice %arg3[%c7_i32, %c0_i32_76] : memref<8x128xf32, #tpu.memory_space<vmem>> -> memref<1x128xf32, #tpu.memory_space<vmem>>
      %127 = tpu.memref_slice %arg4[%124] : memref<8x!tpu.dma_semaphore, #tpu.memory_space<semaphore_mem>> -> memref<1x!tpu.dma_semaphore, #tpu.memory_space<semaphore_mem>>
      %128 = tpu.memref_squeeze %127 : memref<1x!tpu.dma_semaphore, #tpu.memory_space<semaphore_mem>> -> memref<!tpu.dma_semaphore, #tpu.memory_space<semaphore_mem>>
      tpu.enqueue_dma source(%125 : memref<1x128xf32, #tpu.memory_space<any>>) target(%126 : memref<1x128xf32, #tpu.memory_space<vmem>>) target_semaphore(%128 : memref<!tpu.dma_semaphore, #tpu.memory_space<semaphore_mem>>)
    } else {
    }
    %c8_i32_16 = arith.constant 8 : i32
    %c0_i32_17 = arith.constant 0 : i32
    %33 = arith.addi %0, %c0_i32_17 : i32
    %c8_i32_18 = arith.constant 8 : i32
    %34 = arith.cmpi slt, %33, %c8_i32_18 : i32
    %35 = arith.extui %34 : i1 to i32
    %c0_i32_19 = arith.constant 0 : i32
    %36 = arith.cmpi ne, %35, %c0_i32_19 : i32
    scf.if %36 {
      %121 = arith.addi %0, %c0_i32_17 : i32
      %122 = arith.index_cast %121 : i32 to index
      %123 = memref.load %arg1[%122] : memref<8xi32, #tpu.memory_space<smem>>
      %c7_i32_74 = arith.constant 7 : i32
      %124 = arith.andi %c0_i32_17, %c7_i32_74 : i32
      %c0_i32_75 = arith.constant 0 : i32
      %125 = tpu.memref_slice %arg2[%123, %c0_i32_75] : memref<64x128xf32, #tpu.memory_space<any>> -> memref<1x128xf32, #tpu.memory_space<any>>
      %c0_i32_76 = arith.constant 0 : i32
      %126 = tpu.memref_slice %arg3[%c0_i32_17, %c0_i32_76] : memref<8x128xf32, #tpu.memory_space<vmem>> -> memref<1x128xf32, #tpu.memory_space<vmem>>
      %127 = tpu.memref_slice %arg4[%124] : memref<8x!tpu.dma_semaphore, #tpu.memory_space<semaphore_mem>> -> memref<1x!tpu.dma_semaphore, #tpu.memory_space<semaphore_mem>>
      %128 = tpu.memref_squeeze %127 : memref<1x!tpu.dma_semaphore, #tpu.memory_space<semaphore_mem>> -> memref<!tpu.dma_semaphore, #tpu.memory_space<semaphore_mem>>
      tpu.wait_dma2 semaphore(%128 : memref<!tpu.dma_semaphore, #tpu.memory_space<semaphore_mem>>) src(%125 : memref<1x128xf32, #tpu.memory_space<any>>) dst(%126 : memref<1x128xf32, #tpu.memory_space<vmem>>)
    } else {
    }
    %c8_i32_20 = arith.constant 8 : i32
    %37 = arith.addi %c0_i32_17, %c8_i32_20 : i32
    %c8_i32_21 = arith.constant 8 : i32
    %38 = arith.cmpi slt, %37, %c8_i32_21 : i32
    %39 = arith.addi %0, %37 : i32
    %c8_i32_22 = arith.constant 8 : i32
    %40 = arith.cmpi slt, %39, %c8_i32_22 : i32
    %41 = arith.andi %38, %40 : i1
    %42 = arith.extui %41 : i1 to i32
    %c0_i32_23 = arith.constant 0 : i32
    %43 = arith.cmpi ne, %42, %c0_i32_23 : i32
    scf.if %43 {
      %121 = arith.addi %0, %37 : i32
      %122 = arith.index_cast %121 : i32 to index
      %123 = memref.load %arg1[%122] : memref<8xi32, #tpu.memory_space<smem>>
      %c7_i32_74 = arith.constant 7 : i32
      %124 = arith.andi %37, %c7_i32_74 : i32
      %c0_i32_75 = arith.constant 0 : i32
      %125 = tpu.memref_slice %arg2[%123, %c0_i32_75] : memref<64x128xf32, #tpu.memory_space<any>> -> memref<1x128xf32, #tpu.memory_space<any>>
      %c0_i32_76 = arith.constant 0 : i32
      %126 = tpu.memref_slice %arg3[%37, %c0_i32_76] : memref<8x128xf32, #tpu.memory_space<vmem>> -> memref<1x128xf32, #tpu.memory_space<vmem>>
      %127 = tpu.memref_slice %arg4[%124] : memref<8x!tpu.dma_semaphore, #tpu.memory_space<semaphore_mem>> -> memref<1x!tpu.dma_semaphore, #tpu.memory_space<semaphore_mem>>
      %128 = tpu.memref_squeeze %127 : memref<1x!tpu.dma_semaphore, #tpu.memory_space<semaphore_mem>> -> memref<!tpu.dma_semaphore, #tpu.memory_space<semaphore_mem>>
      tpu.enqueue_dma source(%125 : memref<1x128xf32, #tpu.memory_space<any>>) target(%126 : memref<1x128xf32, #tpu.memory_space<vmem>>) target_semaphore(%128 : memref<!tpu.dma_semaphore, #tpu.memory_space<semaphore_mem>>)
    } else {
    }
    %c1_i32_24 = arith.constant 1 : i32
    %44 = arith.addi %0, %c1_i32_24 : i32
    %c8_i32_25 = arith.constant 8 : i32
    %45 = arith.cmpi slt, %44, %c8_i32_25 : i32
    %46 = arith.extui %45 : i1 to i32
    %c0_i32_26 = arith.constant 0 : i32
    %47 = arith.cmpi ne, %46, %c0_i32_26 : i32
    scf.if %47 {
      %121 = arith.addi %0, %c1_i32_24 : i32
      %122 = arith.index_cast %121 : i32 to index
      %123 = memref.load %arg1[%122] : memref<8xi32, #tpu.memory_space<smem>>
      %c7_i32_74 = arith.constant 7 : i32
      %124 = arith.andi %c1_i32_24, %c7_i32_74 : i32
      %c0_i32_75 = arith.constant 0 : i32
      %125 = tpu.memref_slice %arg2[%123, %c0_i32_75] : memref<64x128xf32, #tpu.memory_space<any>> -> memref<1x128xf32, #tpu.memory_space<any>>
      %c0_i32_76 = arith.constant 0 : i32
      %126 = tpu.memref_slice %arg3[%c1_i32_24, %c0_i32_76] : memref<8x128xf32, #tpu.memory_space<vmem>> -> memref<1x128xf32, #tpu.memory_space<vmem>>
      %127 = tpu.memref_slice %arg4[%124] : memref<8x!tpu.dma_semaphore, #tpu.memory_space<semaphore_mem>> -> memref<1x!tpu.dma_semaphore, #tpu.memory_space<semaphore_mem>>
      %128 = tpu.memref_squeeze %127 : memref<1x!tpu.dma_semaphore, #tpu.memory_space<semaphore_mem>> -> memref<!tpu.dma_semaphore, #tpu.memory_space<semaphore_mem>>
      tpu.wait_dma2 semaphore(%128 : memref<!tpu.dma_semaphore, #tpu.memory_space<semaphore_mem>>) src(%125 : memref<1x128xf32, #tpu.memory_space<any>>) dst(%126 : memref<1x128xf32, #tpu.memory_space<vmem>>)
    } else {
    }
    %c8_i32_27 = arith.constant 8 : i32
    %48 = arith.addi %c1_i32_24, %c8_i32_27 : i32
    %c8_i32_28 = arith.constant 8 : i32
    %49 = arith.cmpi slt, %48, %c8_i32_28 : i32
    %50 = arith.addi %0, %48 : i32
    %c8_i32_29 = arith.constant 8 : i32
    %51 = arith.cmpi slt, %50, %c8_i32_29 : i32
    %52 = arith.andi %49, %51 : i1
    %53 = arith.extui %52 : i1 to i32
    %c0_i32_30 = arith.constant 0 : i32
    %54 = arith.cmpi ne, %53, %c0_i32_30 : i32
    scf.if %54 {
      %121 = arith.addi %0, %48 : i32
      %122 = arith.index_cast %121 : i32 to index
      %123 = memref.load %arg1[%122] : memref<8xi32, #tpu.memory_space<smem>>
      %c7_i32_74 = arith.constant 7 : i32
      %124 = arith.andi %48, %c7_i32_74 : i32
      %c0_i32_75 = arith.constant 0 : i32
      %125 = tpu.memref_slice %arg2[%123, %c0_i32_75] : memref<64x128xf32, #tpu.memory_space<any>> -> memref<1x128xf32, #tpu.memory_space<any>>
      %c0_i32_76 = arith.constant 0 : i32
      %126 = tpu.memref_slice %arg3[%48, %c0_i32_76] : memref<8x128xf32, #tpu.memory_space<vmem>> -> memref<1x128xf32, #tpu.memory_space<vmem>>
      %127 = tpu.memref_slice %arg4[%124] : memref<8x!tpu.dma_semaphore, #tpu.memory_space<semaphore_mem>> -> memref<1x!tpu.dma_semaphore, #tpu.memory_space<semaphore_mem>>
      %128 = tpu.memref_squeeze %127 : memref<1x!tpu.dma_semaphore, #tpu.memory_space<semaphore_mem>> -> memref<!tpu.dma_semaphore, #tpu.memory_space<semaphore_mem>>
      tpu.enqueue_dma source(%125 : memref<1x128xf32, #tpu.memory_space<any>>) target(%126 : memref<1x128xf32, #tpu.memory_space<vmem>>) target_semaphore(%128 : memref<!tpu.dma_semaphore, #tpu.memory_space<semaphore_mem>>)
    } else {
    }
    %c2_i32_31 = arith.constant 2 : i32
    %55 = arith.addi %0, %c2_i32_31 : i32
    %c8_i32_32 = arith.constant 8 : i32
    %56 = arith.cmpi slt, %55, %c8_i32_32 : i32
    %57 = arith.extui %56 : i1 to i32
    %c0_i32_33 = arith.constant 0 : i32
    %58 = arith.cmpi ne, %57, %c0_i32_33 : i32
    scf.if %58 {
      %121 = arith.addi %0, %c2_i32_31 : i32
      %122 = arith.index_cast %121 : i32 to index
      %123 = memref.load %arg1[%122] : memref<8xi32, #tpu.memory_space<smem>>
      %c7_i32_74 = arith.constant 7 : i32
      %124 = arith.andi %c2_i32_31, %c7_i32_74 : i32
      %c0_i32_75 = arith.constant 0 : i32
      %125 = tpu.memref_slice %arg2[%123, %c0_i32_75] : memref<64x128xf32, #tpu.memory_space<any>> -> memref<1x128xf32, #tpu.memory_space<any>>
      %c0_i32_76 = arith.constant 0 : i32
      %126 = tpu.memref_slice %arg3[%c2_i32_31, %c0_i32_76] : memref<8x128xf32, #tpu.memory_space<vmem>> -> memref<1x128xf32, #tpu.memory_space<vmem>>
      %127 = tpu.memref_slice %arg4[%124] : memref<8x!tpu.dma_semaphore, #tpu.memory_space<semaphore_mem>> -> memref<1x!tpu.dma_semaphore, #tpu.memory_space<semaphore_mem>>
      %128 = tpu.memref_squeeze %127 : memref<1x!tpu.dma_semaphore, #tpu.memory_space<semaphore_mem>> -> memref<!tpu.dma_semaphore, #tpu.memory_space<semaphore_mem>>
      tpu.wait_dma2 semaphore(%128 : memref<!tpu.dma_semaphore, #tpu.memory_space<semaphore_mem>>) src(%125 : memref<1x128xf32, #tpu.memory_space<any>>) dst(%126 : memref<1x128xf32, #tpu.memory_space<vmem>>)
    } else {
    }
    %c8_i32_34 = arith.constant 8 : i32
    %59 = arith.addi %c2_i32_31, %c8_i32_34 : i32
    %c8_i32_35 = arith.constant 8 : i32
    %60 = arith.cmpi slt, %59, %c8_i32_35 : i32
    %61 = arith.addi %0, %59 : i32
    %c8_i32_36 = arith.constant 8 : i32
    %62 = arith.cmpi slt, %61, %c8_i32_36 : i32
    %63 = arith.andi %60, %62 : i1
    %64 = arith.extui %63 : i1 to i32
    %c0_i32_37 = arith.constant 0 : i32
    %65 = arith.cmpi ne, %64, %c0_i32_37 : i32
    scf.if %65 {
      %121 = arith.addi %0, %59 : i32
      %122 = arith.index_cast %121 : i32 to index
      %123 = memref.load %arg1[%122] : memref<8xi32, #tpu.memory_space<smem>>
      %c7_i32_74 = arith.constant 7 : i32
      %124 = arith.andi %59, %c7_i32_74 : i32
      %c0_i32_75 = arith.constant 0 : i32
      %125 = tpu.memref_slice %arg2[%123, %c0_i32_75] : memref<64x128xf32, #tpu.memory_space<any>> -> memref<1x128xf32, #tpu.memory_space<any>>
      %c0_i32_76 = arith.constant 0 : i32
      %126 = tpu.memref_slice %arg3[%59, %c0_i32_76] : memref<8x128xf32, #tpu.memory_space<vmem>> -> memref<1x128xf32, #tpu.memory_space<vmem>>
      %127 = tpu.memref_slice %arg4[%124] : memref<8x!tpu.dma_semaphore, #tpu.memory_space<semaphore_mem>> -> memref<1x!tpu.dma_semaphore, #tpu.memory_space<semaphore_mem>>
      %128 = tpu.memref_squeeze %127 : memref<1x!tpu.dma_semaphore, #tpu.memory_space<semaphore_mem>> -> memref<!tpu.dma_semaphore, #tpu.memory_space<semaphore_mem>>
      tpu.enqueue_dma source(%125 : memref<1x128xf32, #tpu.memory_space<any>>) target(%126 : memref<1x128xf32, #tpu.memory_space<vmem>>) target_semaphore(%128 : memref<!tpu.dma_semaphore, #tpu.memory_space<semaphore_mem>>)
    } else {
    }
    %c3_i32_38 = arith.constant 3 : i32
    %66 = arith.addi %0, %c3_i32_38 : i32
    %c8_i32_39 = arith.constant 8 : i32
    %67 = arith.cmpi slt, %66, %c8_i32_39 : i32
    %68 = arith.extui %67 : i1 to i32
    %c0_i32_40 = arith.constant 0 : i32
    %69 = arith.cmpi ne, %68, %c0_i32_40 : i32
    scf.if %69 {
      %121 = arith.addi %0, %c3_i32_38 : i32
      %122 = arith.index_cast %121 : i32 to index
      %123 = memref.load %arg1[%122] : memref<8xi32, #tpu.memory_space<smem>>
      %c7_i32_74 = arith.constant 7 : i32
      %124 = arith.andi %c3_i32_38, %c7_i32_74 : i32
      %c0_i32_75 = arith.constant 0 : i32
      %125 = tpu.memref_slice %arg2[%123, %c0_i32_75] : memref<64x128xf32, #tpu.memory_space<any>> -> memref<1x128xf32, #tpu.memory_space<any>>
      %c0_i32_76 = arith.constant 0 : i32
      %126 = tpu.memref_slice %arg3[%c3_i32_38, %c0_i32_76] : memref<8x128xf32, #tpu.memory_space<vmem>> -> memref<1x128xf32, #tpu.memory_space<vmem>>
      %127 = tpu.memref_slice %arg4[%124] : memref<8x!tpu.dma_semaphore, #tpu.memory_space<semaphore_mem>> -> memref<1x!tpu.dma_semaphore, #tpu.memory_space<semaphore_mem>>
      %128 = tpu.memref_squeeze %127 : memref<1x!tpu.dma_semaphore, #tpu.memory_space<semaphore_mem>> -> memref<!tpu.dma_semaphore, #tpu.memory_space<semaphore_mem>>
      tpu.wait_dma2 semaphore(%128 : memref<!tpu.dma_semaphore, #tpu.memory_space<semaphore_mem>>) src(%125 : memref<1x128xf32, #tpu.memory_space<any>>) dst(%126 : memref<1x128xf32, #tpu.memory_space<vmem>>)
    } else {
    }
    %c8_i32_41 = arith.constant 8 : i32
    %70 = arith.addi %c3_i32_38, %c8_i32_41 : i32
    %c8_i32_42 = arith.constant 8 : i32
    %71 = arith.cmpi slt, %70, %c8_i32_42 : i32
    %72 = arith.addi %0, %70 : i32
    %c8_i32_43 = arith.constant 8 : i32
    %73 = arith.cmpi slt, %72, %c8_i32_43 : i32
    %74 = arith.andi %71, %73 : i1
    %75 = arith.extui %74 : i1 to i32
    %c0_i32_44 = arith.constant 0 : i32
    %76 = arith.cmpi ne, %75, %c0_i32_44 : i32
    scf.if %76 {
      %121 = arith.addi %0, %70 : i32
      %122 = arith.index_cast %121 : i32 to index
      %123 = memref.load %arg1[%122] : memref<8xi32, #tpu.memory_space<smem>>
      %c7_i32_74 = arith.constant 7 : i32
      %124 = arith.andi %70, %c7_i32_74 : i32
      %c0_i32_75 = arith.constant 0 : i32
      %125 = tpu.memref_slice %arg2[%123, %c0_i32_75] : memref<64x128xf32, #tpu.memory_space<any>> -> memref<1x128xf32, #tpu.memory_space<any>>
      %c0_i32_76 = arith.constant 0 : i32
      %126 = tpu.memref_slice %arg3[%70, %c0_i32_76] : memref<8x128xf32, #tpu.memory_space<vmem>> -> memref<1x128xf32, #tpu.memory_space<vmem>>
      %127 = tpu.memref_slice %arg4[%124] : memref<8x!tpu.dma_semaphore, #tpu.memory_space<semaphore_mem>> -> memref<1x!tpu.dma_semaphore, #tpu.memory_space<semaphore_mem>>
      %128 = tpu.memref_squeeze %127 : memref<1x!tpu.dma_semaphore, #tpu.memory_space<semaphore_mem>> -> memref<!tpu.dma_semaphore, #tpu.memory_space<semaphore_mem>>
      tpu.enqueue_dma source(%125 : memref<1x128xf32, #tpu.memory_space<any>>) target(%126 : memref<1x128xf32, #tpu.memory_space<vmem>>) target_semaphore(%128 : memref<!tpu.dma_semaphore, #tpu.memory_space<semaphore_mem>>)
    } else {
    }
    %c4_i32_45 = arith.constant 4 : i32
    %77 = arith.addi %0, %c4_i32_45 : i32
    %c8_i32_46 = arith.constant 8 : i32
    %78 = arith.cmpi slt, %77, %c8_i32_46 : i32
    %79 = arith.extui %78 : i1 to i32
    %c0_i32_47 = arith.constant 0 : i32
    %80 = arith.cmpi ne, %79, %c0_i32_47 : i32
    scf.if %80 {
      %121 = arith.addi %0, %c4_i32_45 : i32
      %122 = arith.index_cast %121 : i32 to index
      %123 = memref.load %arg1[%122] : memref<8xi32, #tpu.memory_space<smem>>
      %c7_i32_74 = arith.constant 7 : i32
      %124 = arith.andi %c4_i32_45, %c7_i32_74 : i32
      %c0_i32_75 = arith.constant 0 : i32
      %125 = tpu.memref_slice %arg2[%123, %c0_i32_75] : memref<64x128xf32, #tpu.memory_space<any>> -> memref<1x128xf32, #tpu.memory_space<any>>
      %c0_i32_76 = arith.constant 0 : i32
      %126 = tpu.memref_slice %arg3[%c4_i32_45, %c0_i32_76] : memref<8x128xf32, #tpu.memory_space<vmem>> -> memref<1x128xf32, #tpu.memory_space<vmem>>
      %127 = tpu.memref_slice %arg4[%124] : memref<8x!tpu.dma_semaphore, #tpu.memory_space<semaphore_mem>> -> memref<1x!tpu.dma_semaphore, #tpu.memory_space<semaphore_mem>>
      %128 = tpu.memref_squeeze %127 : memref<1x!tpu.dma_semaphore, #tpu.memory_space<semaphore_mem>> -> memref<!tpu.dma_semaphore, #tpu.memory_space<semaphore_mem>>
      tpu.wait_dma2 semaphore(%128 : memref<!tpu.dma_semaphore, #tpu.memory_space<semaphore_mem>>) src(%125 : memref<1x128xf32, #tpu.memory_space<any>>) dst(%126 : memref<1x128xf32, #tpu.memory_space<vmem>>)
    } else {
    }
    %c8_i32_48 = arith.constant 8 : i32
    %81 = arith.addi %c4_i32_45, %c8_i32_48 : i32
    %c8_i32_49 = arith.constant 8 : i32
    %82 = arith.cmpi slt, %81, %c8_i32_49 : i32
    %83 = arith.addi %0, %81 : i32
    %c8_i32_50 = arith.constant 8 : i32
    %84 = arith.cmpi slt, %83, %c8_i32_50 : i32
    %85 = arith.andi %82, %84 : i1
    %86 = arith.extui %85 : i1 to i32
    %c0_i32_51 = arith.constant 0 : i32
    %87 = arith.cmpi ne, %86, %c0_i32_51 : i32
    scf.if %87 {
      %121 = arith.addi %0, %81 : i32
      %122 = arith.index_cast %121 : i32 to index
      %123 = memref.load %arg1[%122] : memref<8xi32, #tpu.memory_space<smem>>
      %c7_i32_74 = arith.constant 7 : i32
      %124 = arith.andi %81, %c7_i32_74 : i32
      %c0_i32_75 = arith.constant 0 : i32
      %125 = tpu.memref_slice %arg2[%123, %c0_i32_75] : memref<64x128xf32, #tpu.memory_space<any>> -> memref<1x128xf32, #tpu.memory_space<any>>
      %c0_i32_76 = arith.constant 0 : i32
      %126 = tpu.memref_slice %arg3[%81, %c0_i32_76] : memref<8x128xf32, #tpu.memory_space<vmem>> -> memref<1x128xf32, #tpu.memory_space<vmem>>
      %127 = tpu.memref_slice %arg4[%124] : memref<8x!tpu.dma_semaphore, #tpu.memory_space<semaphore_mem>> -> memref<1x!tpu.dma_semaphore, #tpu.memory_space<semaphore_mem>>
      %128 = tpu.memref_squeeze %127 : memref<1x!tpu.dma_semaphore, #tpu.memory_space<semaphore_mem>> -> memref<!tpu.dma_semaphore, #tpu.memory_space<semaphore_mem>>
      tpu.enqueue_dma source(%125 : memref<1x128xf32, #tpu.memory_space<any>>) target(%126 : memref<1x128xf32, #tpu.memory_space<vmem>>) target_semaphore(%128 : memref<!tpu.dma_semaphore, #tpu.memory_space<semaphore_mem>>)
    } else {
    }
    %c5_i32_52 = arith.constant 5 : i32
    %88 = arith.addi %0, %c5_i32_52 : i32
    %c8_i32_53 = arith.constant 8 : i32
    %89 = arith.cmpi slt, %88, %c8_i32_53 : i32
    %90 = arith.extui %89 : i1 to i32
    %c0_i32_54 = arith.constant 0 : i32
    %91 = arith.cmpi ne, %90, %c0_i32_54 : i32
    scf.if %91 {
      %121 = arith.addi %0, %c5_i32_52 : i32
      %122 = arith.index_cast %121 : i32 to index
      %123 = memref.load %arg1[%122] : memref<8xi32, #tpu.memory_space<smem>>
      %c7_i32_74 = arith.constant 7 : i32
      %124 = arith.andi %c5_i32_52, %c7_i32_74 : i32
      %c0_i32_75 = arith.constant 0 : i32
      %125 = tpu.memref_slice %arg2[%123, %c0_i32_75] : memref<64x128xf32, #tpu.memory_space<any>> -> memref<1x128xf32, #tpu.memory_space<any>>
      %c0_i32_76 = arith.constant 0 : i32
      %126 = tpu.memref_slice %arg3[%c5_i32_52, %c0_i32_76] : memref<8x128xf32, #tpu.memory_space<vmem>> -> memref<1x128xf32, #tpu.memory_space<vmem>>
      %127 = tpu.memref_slice %arg4[%124] : memref<8x!tpu.dma_semaphore, #tpu.memory_space<semaphore_mem>> -> memref<1x!tpu.dma_semaphore, #tpu.memory_space<semaphore_mem>>
      %128 = tpu.memref_squeeze %127 : memref<1x!tpu.dma_semaphore, #tpu.memory_space<semaphore_mem>> -> memref<!tpu.dma_semaphore, #tpu.memory_space<semaphore_mem>>
      tpu.wait_dma2 semaphore(%128 : memref<!tpu.dma_semaphore, #tpu.memory_space<semaphore_mem>>) src(%125 : memref<1x128xf32, #tpu.memory_space<any>>) dst(%126 : memref<1x128xf32, #tpu.memory_space<vmem>>)
    } else {
    }
    %c8_i32_55 = arith.constant 8 : i32
    %92 = arith.addi %c5_i32_52, %c8_i32_55 : i32
    %c8_i32_56 = arith.constant 8 : i32
    %93 = arith.cmpi slt, %92, %c8_i32_56 : i32
    %94 = arith.addi %0, %92 : i32
    %c8_i32_57 = arith.constant 8 : i32
    %95 = arith.cmpi slt, %94, %c8_i32_57 : i32
    %96 = arith.andi %93, %95 : i1
    %97 = arith.extui %96 : i1 to i32
    %c0_i32_58 = arith.constant 0 : i32
    %98 = arith.cmpi ne, %97, %c0_i32_58 : i32
    scf.if %98 {
      %121 = arith.addi %0, %92 : i32
      %122 = arith.index_cast %121 : i32 to index
      %123 = memref.load %arg1[%122] : memref<8xi32, #tpu.memory_space<smem>>
      %c7_i32_74 = arith.constant 7 : i32
      %124 = arith.andi %92, %c7_i32_74 : i32
      %c0_i32_75 = arith.constant 0 : i32
      %125 = tpu.memref_slice %arg2[%123, %c0_i32_75] : memref<64x128xf32, #tpu.memory_space<any>> -> memref<1x128xf32, #tpu.memory_space<any>>
      %c0_i32_76 = arith.constant 0 : i32
      %126 = tpu.memref_slice %arg3[%92, %c0_i32_76] : memref<8x128xf32, #tpu.memory_space<vmem>> -> memref<1x128xf32, #tpu.memory_space<vmem>>
      %127 = tpu.memref_slice %arg4[%124] : memref<8x!tpu.dma_semaphore, #tpu.memory_space<semaphore_mem>> -> memref<1x!tpu.dma_semaphore, #tpu.memory_space<semaphore_mem>>
      %128 = tpu.memref_squeeze %127 : memref<1x!tpu.dma_semaphore, #tpu.memory_space<semaphore_mem>> -> memref<!tpu.dma_semaphore, #tpu.memory_space<semaphore_mem>>
      tpu.enqueue_dma source(%125 : memref<1x128xf32, #tpu.memory_space<any>>) target(%126 : memref<1x128xf32, #tpu.memory_space<vmem>>) target_semaphore(%128 : memref<!tpu.dma_semaphore, #tpu.memory_space<semaphore_mem>>)
    } else {
    }
    %c6_i32_59 = arith.constant 6 : i32
    %99 = arith.addi %0, %c6_i32_59 : i32
    %c8_i32_60 = arith.constant 8 : i32
    %100 = arith.cmpi slt, %99, %c8_i32_60 : i32
    %101 = arith.extui %100 : i1 to i32
    %c0_i32_61 = arith.constant 0 : i32
    %102 = arith.cmpi ne, %101, %c0_i32_61 : i32
    scf.if %102 {
      %121 = arith.addi %0, %c6_i32_59 : i32
      %122 = arith.index_cast %121 : i32 to index
      %123 = memref.load %arg1[%122] : memref<8xi32, #tpu.memory_space<smem>>
      %c7_i32_74 = arith.constant 7 : i32
      %124 = arith.andi %c6_i32_59, %c7_i32_74 : i32
      %c0_i32_75 = arith.constant 0 : i32
      %125 = tpu.memref_slice %arg2[%123, %c0_i32_75] : memref<64x128xf32, #tpu.memory_space<any>> -> memref<1x128xf32, #tpu.memory_space<any>>
      %c0_i32_76 = arith.constant 0 : i32
      %126 = tpu.memref_slice %arg3[%c6_i32_59, %c0_i32_76] : memref<8x128xf32, #tpu.memory_space<vmem>> -> memref<1x128xf32, #tpu.memory_space<vmem>>
      %127 = tpu.memref_slice %arg4[%124] : memref<8x!tpu.dma_semaphore, #tpu.memory_space<semaphore_mem>> -> memref<1x!tpu.dma_semaphore, #tpu.memory_space<semaphore_mem>>
      %128 = tpu.memref_squeeze %127 : memref<1x!tpu.dma_semaphore, #tpu.memory_space<semaphore_mem>> -> memref<!tpu.dma_semaphore, #tpu.memory_space<semaphore_mem>>
      tpu.wait_dma2 semaphore(%128 : memref<!tpu.dma_semaphore, #tpu.memory_space<semaphore_mem>>) src(%125 : memref<1x128xf32, #tpu.memory_space<any>>) dst(%126 : memref<1x128xf32, #tpu.memory_space<vmem>>)
    } else {
    }
    %c8_i32_62 = arith.constant 8 : i32
    %103 = arith.addi %c6_i32_59, %c8_i32_62 : i32
    %c8_i32_63 = arith.constant 8 : i32
    %104 = arith.cmpi slt, %103, %c8_i32_63 : i32
    %105 = arith.addi %0, %103 : i32
    %c8_i32_64 = arith.constant 8 : i32
    %106 = arith.cmpi slt, %105, %c8_i32_64 : i32
    %107 = arith.andi %104, %106 : i1
    %108 = arith.extui %107 : i1 to i32
    %c0_i32_65 = arith.constant 0 : i32
    %109 = arith.cmpi ne, %108, %c0_i32_65 : i32
    scf.if %109 {
      %121 = arith.addi %0, %103 : i32
      %122 = arith.index_cast %121 : i32 to index
      %123 = memref.load %arg1[%122] : memref<8xi32, #tpu.memory_space<smem>>
      %c7_i32_74 = arith.constant 7 : i32
      %124 = arith.andi %103, %c7_i32_74 : i32
      %c0_i32_75 = arith.constant 0 : i32
      %125 = tpu.memref_slice %arg2[%123, %c0_i32_75] : memref<64x128xf32, #tpu.memory_space<any>> -> memref<1x128xf32, #tpu.memory_space<any>>
      %c0_i32_76 = arith.constant 0 : i32
      %126 = tpu.memref_slice %arg3[%103, %c0_i32_76] : memref<8x128xf32, #tpu.memory_space<vmem>> -> memref<1x128xf32, #tpu.memory_space<vmem>>
      %127 = tpu.memref_slice %arg4[%124] : memref<8x!tpu.dma_semaphore, #tpu.memory_space<semaphore_mem>> -> memref<1x!tpu.dma_semaphore, #tpu.memory_space<semaphore_mem>>
      %128 = tpu.memref_squeeze %127 : memref<1x!tpu.dma_semaphore, #tpu.memory_space<semaphore_mem>> -> memref<!tpu.dma_semaphore, #tpu.memory_space<semaphore_mem>>
      tpu.enqueue_dma source(%125 : memref<1x128xf32, #tpu.memory_space<any>>) target(%126 : memref<1x128xf32, #tpu.memory_space<vmem>>) target_semaphore(%128 : memref<!tpu.dma_semaphore, #tpu.memory_space<semaphore_mem>>)
    } else {
    }
    %c7_i32_66 = arith.constant 7 : i32
    %110 = arith.addi %0, %c7_i32_66 : i32
    %c8_i32_67 = arith.constant 8 : i32
    %111 = arith.cmpi slt, %110, %c8_i32_67 : i32
    %112 = arith.extui %111 : i1 to i32
    %c0_i32_68 = arith.constant 0 : i32
    %113 = arith.cmpi ne, %112, %c0_i32_68 : i32
    scf.if %113 {
      %121 = arith.addi %0, %c7_i32_66 : i32
      %122 = arith.index_cast %121 : i32 to index
      %123 = memref.load %arg1[%122] : memref<8xi32, #tpu.memory_space<smem>>
      %c7_i32_74 = arith.constant 7 : i32
      %124 = arith.andi %c7_i32_66, %c7_i32_74 : i32
      %c0_i32_75 = arith.constant 0 : i32
      %125 = tpu.memref_slice %arg2[%123, %c0_i32_75] : memref<64x128xf32, #tpu.memory_space<any>> -> memref<1x128xf32, #tpu.memory_space<any>>
      %c0_i32_76 = arith.constant 0 : i32
      %126 = tpu.memref_slice %arg3[%c7_i32_66, %c0_i32_76] : memref<8x128xf32, #tpu.memory_space<vmem>> -> memref<1x128xf32, #tpu.memory_space<vmem>>
      %127 = tpu.memref_slice %arg4[%124] : memref<8x!tpu.dma_semaphore, #tpu.memory_space<semaphore_mem>> -> memref<1x!tpu.dma_semaphore, #tpu.memory_space<semaphore_mem>>
      %128 = tpu.memref_squeeze %127 : memref<1x!tpu.dma_semaphore, #tpu.memory_space<semaphore_mem>> -> memref<!tpu.dma_semaphore, #tpu.memory_space<semaphore_mem>>
      tpu.wait_dma2 semaphore(%128 : memref<!tpu.dma_semaphore, #tpu.memory_space<semaphore_mem>>) src(%125 : memref<1x128xf32, #tpu.memory_space<any>>) dst(%126 : memref<1x128xf32, #tpu.memory_space<vmem>>)
    } else {
    }
    %c8_i32_69 = arith.constant 8 : i32
    %114 = arith.addi %c7_i32_66, %c8_i32_69 : i32
    %c8_i32_70 = arith.constant 8 : i32
    %115 = arith.cmpi slt, %114, %c8_i32_70 : i32
    %116 = arith.addi %0, %114 : i32
    %c8_i32_71 = arith.constant 8 : i32
    %117 = arith.cmpi slt, %116, %c8_i32_71 : i32
    %118 = arith.andi %115, %117 : i1
    %119 = arith.extui %118 : i1 to i32
    %c0_i32_72 = arith.constant 0 : i32
    %120 = arith.cmpi ne, %119, %c0_i32_72 : i32
    scf.if %120 {
      %121 = arith.addi %0, %114 : i32
      %122 = arith.index_cast %121 : i32 to index
      %123 = memref.load %arg1[%122] : memref<8xi32, #tpu.memory_space<smem>>
      %c7_i32_74 = arith.constant 7 : i32
      %124 = arith.andi %114, %c7_i32_74 : i32
      %c0_i32_75 = arith.constant 0 : i32
      %125 = tpu.memref_slice %arg2[%123, %c0_i32_75] : memref<64x128xf32, #tpu.memory_space<any>> -> memref<1x128xf32, #tpu.memory_space<any>>
      %c0_i32_76 = arith.constant 0 : i32
      %126 = tpu.memref_slice %arg3[%114, %c0_i32_76] : memref<8x128xf32, #tpu.memory_space<vmem>> -> memref<1x128xf32, #tpu.memory_space<vmem>>
      %127 = tpu.memref_slice %arg4[%124] : memref<8x!tpu.dma_semaphore, #tpu.memory_space<semaphore_mem>> -> memref<1x!tpu.dma_semaphore, #tpu.memory_space<semaphore_mem>>
      %128 = tpu.memref_squeeze %127 : memref<1x!tpu.dma_semaphore, #tpu.memory_space<semaphore_mem>> -> memref<!tpu.dma_semaphore, #tpu.memory_space<semaphore_mem>>
      tpu.enqueue_dma source(%125 : memref<1x128xf32, #tpu.memory_space<any>>) target(%126 : memref<1x128xf32, #tpu.memory_space<vmem>>) target_semaphore(%128 : memref<!tpu.dma_semaphore, #tpu.memory_space<semaphore_mem>>)
    } else {
    }
    %c8_i32_73 = arith.constant 8 : i32
    return
  }
  func.func @transform_1(%arg0: i32, %arg1: memref<8xi32, #tpu.memory_space<smem>>) -> (i32, i32) {
    %c0_i32 = arith.constant 0 : i32
    %c0_i32_0 = arith.constant 0 : i32
    return %arg0, %c0_i32 : i32, i32
  }
}

</mosaic_0001>

<bundles_post_ra>
// kernel: tpu_custom_call.1
= control target key start
LH: loop header
LB: loop body
LE: loop exit
PB: predicated region body
PF: predicated region fallthrough
CT: control target
= control target key end

     0   :  { %s789_s0 = inlined_call_operand.hbm [shape: s32[8], index: 0, kind: input, shape index: {}]   ;;  %s790_s1 = inlined_call_operand.hbm [shape: f32[64,128], index: 1, kind: input, shape index: {}]   ;;  %s791_s2 = inlined_call_operand.hbm [shape: f32[8,128], index: 2, kind: output, shape index: {}]  }
   0x1   :  { %s358_s11 = scalar_lea.hbm %s789_s0, 16 }
   0x2   :  { %p359_p0 = scmp.ne.s32.totalorder %s789_s0, %s358_s11  ;;  %p362_p1 = scmp.lt.u32.totalorder %s358_s11, %s789_s0 }
   0x4   :  { %p364_p2 = pnand %p362_p1, %p359_p0 }
   0x6   :  { %367 = shalt.err (!%p364_p2)  }
   0x7   :  { %s602_s16 = smov [#allocation4]  }
   0x8   :  { %8 = dma.hbm_to_smem %s789_s0, 16, %s602_s16, [#allocation3] }
   0x9   :  { %582 = dma.done.wait [#allocation3], 16 }
   0xa   :  { %583 = vsyncadd [#allocation3], 4294967280 }
   0xb   :  { %10 = sfence }
   0xc   :  { %11 = vsyncpa [#allocation6], 0  ;;  %s17_s19 = sld [smem:[#allocation4]]  ;;  %s603_s20 = smov [#allocation5]  }
   0xd   :  { %s27_s21 = sshll.u32 %s603_s20, 4  ;;  %s638_s22 = sld [smem:[#allocation4 + $0x1]]  ;;  %s640_s21 = int_to_ptr.vmem [resolvable:$true] %s27_s21 }
   0xe   :  { %s604_s23 = smov [#allocation5 + $0x1]   ;;  %s642_s25 = sld [smem:[#allocation4 + $0x2]] }
   0xf   :  { %s48_s24 = sshll.u32 %s604_s23, 4  ;;  %s605_s26 = smov [#allocation5 + $0x2]   ;;  %s644_s24 = int_to_ptr.vmem [resolvable:$true] %s48_s24 }
  0x10   :  { %s69_s0 = sshll.u32 %s605_s26, 4  ;;  %s646_s27 = sld [smem:[#allocation4 + $0x3]]  ;;  %s648_s0 = int_to_ptr.vmem [resolvable:$true] %s69_s0 }
  0x11   :  { %s657_s8 = scalar_lea.hbm %s790_s1, 1024 }
  0x12   :  { %s326_s28 = sshll.u32 %s17_s19, 4 }
  0x13   :  { %s19_s3 = scalar_lea.hbm %s790_s1, %s326_s28  ;;  %s328_s4 = sshll.u32 %s638_s22, 4 }
  0x14   :  { %s368_s5 = scalar_lea.hbm %s19_s3, 16  ;;  %p371_p4 = scmp.lt.u32.totalorder %s19_s3, %s790_s1 }
  0x15   :  { %p369_p3 = scmp.ne.s32.totalorder %s19_s3, %s368_s5  ;;  %p372_p5 = scmp.lt.u32.totalorder %s657_s8, %s368_s5 }
  0x16   :  { %p374_p7 = scmp.lt.u32.totalorder %s368_s5, %s19_s3 }
  0x17   :  { %p373_p6 = por %p372_p5, %p371_p4 }
  0x19   :  { %p375_p8 = por %p374_p7, %p373_p6 }
  0x1b   :  { %p376_p9 = pnand %p375_p8, %p369_p3 }
  0x1d   :  { %379 = shalt.err (!%p376_p9)  }
  0x1e   :  { %s380_s11 = scalar_lea.vmem %s640_s21, 16  ;;  %s666_s12 = scalar_lea.vmem %s640_s21, 128 }
  0x1f   :  { %p381_p10 = scmp.ne.s32.totalorder %s640_s21, %s380_s11  ;;  %p385_p11 = scmp.lt.s32.totalorder %s640_s21, %s640_s21 }
  0x20   :  { %p386_p12 = scmp.lt.s32.totalorder %s666_s12, %s380_s11 }
  0x22   :  { %p387_p13 = por %p386_p12, %p385_p11 }
  0x24   :  { %p388_p0 = pnand %p387_p13, %p381_p10 }
  0x26   :  { %391 = shalt.err (!%p388_p0)  }
  0x27   :  { %30 = dma.hbm_to_vmem [thread:$0]  %s19_s3, 16, %s640_s21, [#allocation2] }
  0x28   :  { %s38_s15 = scalar_lea.hbm %s790_s1, %s328_s4  ;;  %s330_s16 = sshll.u32 %s642_s25, 4 }
  0x29   :  { %s392_s17 = scalar_lea.hbm %s38_s15, 16  ;;  %p395_p2 = scmp.lt.u32.totalorder %s38_s15, %s790_s1 }
  0x2a   :  { %p393_p1 = scmp.ne.s32.totalorder %s38_s15, %s392_s17  ;;  %p396_p3 = scmp.lt.u32.totalorder %s657_s8, %s392_s17 }
  0x2b   :  { %p398_p5 = scmp.lt.u32.totalorder %s392_s17, %s38_s15 }
  0x2c   :  { %p397_p4 = por %p396_p3, %p395_p2 }
  0x2e   :  { %p399_p6 = por %p398_p5, %p397_p4 }
  0x30   :  { %p400_p7 = pnand %p399_p6, %p393_p1 }
  0x32   :  { %403 = shalt.err (!%p400_p7)  }
  0x33   :  { %s404_s20 = scalar_lea.vmem %s644_s24, 16  ;;  %p409_p9 = scmp.lt.s32.totalorder %s644_s24, %s640_s21 }
  0x34   :  { %p405_p8 = scmp.ne.s32.totalorder %s644_s24, %s404_s20  ;;  %p410_p10 = scmp.lt.s32.totalorder %s666_s12, %s404_s20 }
  0x36   :  { %p411_p12 = por %p410_p10, %p409_p9 }
  0x38   :  { %p412_p13 = pnand %p411_p12, %p405_p8 }
  0x3a   :  { %415 = shalt.err (!%p412_p13)  }
  0x3b   :  { %51 = dma.hbm_to_vmem [thread:$0]  %s38_s15, 16, %s644_s24, [#allocation2 + $0x1] }
  0x3c   :  { %s59_s25 = scalar_lea.hbm %s790_s1, %s330_s16  ;;  %s332_s26 = sshll.u32 %s646_s27, 4 }
  0x3d   :  { %s416_s28 = scalar_lea.hbm %s59_s25, 16  ;;  %p419_p1 = scmp.lt.u32.totalorder %s59_s25, %s790_s1 }
  0x3e   :  { %p417_p0 = scmp.ne.s32.totalorder %s59_s25, %s416_s28  ;;  %p420_p2 = scmp.lt.u32.totalorder %s657_s8, %s416_s28 }
  0x3f   :  { %p422_p4 = scmp.lt.u32.totalorder %s416_s28, %s59_s25 }
  0x40   :  { %p421_p3 = por %p420_p2, %p419_p1 }
  0x42   :  { %p423_p5 = por %p422_p4, %p421_p3 }
  0x44   :  { %p424_p6 = pnand %p423_p5, %p417_p0 }
  0x46   :  { %427 = shalt.err (!%p424_p6)  }
  0x47   :  { %s428_s24 = scalar_lea.vmem %s648_s0, 16  ;;  %p433_p8 = scmp.lt.s32.totalorder %s648_s0, %s640_s21 }
  0x48   :  { %p429_p7 = scmp.ne.s32.totalorder %s648_s0, %s428_s24  ;;  %p434_p9 = scmp.lt.s32.totalorder %s666_s12, %s428_s24 }
  0x4a   :  { %p435_p10 = por %p434_p9, %p433_p8 }
  0x4c   :  { %p436_p12 = pnand %p435_p10, %p429_p7 }
  0x4e   :  { %439 = shalt.err (!%p436_p12)  }
  0x4f   :  { %72 = dma.hbm_to_vmem [thread:$0]  %s59_s25, 16, %s648_s0, [#allocation2 + $0x2] }
  0x50   :  { %s80_s4 = scalar_lea.hbm %s790_s1, %s332_s26  ;;  %s606_s5 = smov [#allocation5 + $0x3]  }
  0x51   :  { %s90_s6 = sshll.u32 %s606_s5, 4  ;;  %s706_s7 = sld [smem:[#allocation4 + $0x4]]  ;;  %s91_s6 = int_to_ptr.vmem [resolvable:$true] %s90_s6 }
  0x52   :  { %s440_s9 = scalar_lea.hbm %s80_s4, 16  ;;  %p443_p0 = scmp.lt.u32.totalorder %s80_s4, %s790_s1 }
  0x53   :  { %p441_p13 = scmp.ne.s32.totalorder %s80_s4, %s440_s9  ;;  %p444_p1 = scmp.lt.u32.totalorder %s657_s8, %s440_s9 }
  0x54   :  { %p446_p3 = scmp.lt.u32.totalorder %s440_s9, %s80_s4 }
  0x55   :  { %p445_p2 = por %p444_p1, %p443_p0 }
  0x57   :  { %p447_p4 = por %p446_p3, %p445_p2 }
  0x59   :  { %p448_p5 = pnand %p447_p4, %p441_p13 }
  0x5b   :  { %451 = shalt.err (!%p448_p5)  }
  0x5c   :  { %s452_s0 = scalar_lea.vmem %s91_s6, 16  ;;  %p457_p7 = scmp.lt.s32.totalorder %s91_s6, %s640_s21 }
  0x5d   :  { %p453_p6 = scmp.ne.s32.totalorder %s91_s6, %s452_s0  ;;  %p458_p8 = scmp.lt.s32.totalorder %s666_s12, %s452_s0 }
  0x5f   :  { %p459_p9 = por %p458_p8, %p457_p7 }
  0x61   :  { %p460_p10 = pnand %p459_p9, %p453_p6 }
  0x63   :  { %463 = shalt.err (!%p460_p10)  }
  0x64   :  { %93 = dma.hbm_to_vmem [thread:$0]  %s80_s4, 16, %s91_s6, [#allocation2 + $0x3] }
  0x65   :  { %s607_s13 = smov [#allocation5 + $0x4]   ;;  %s714_s15 = sld [smem:[#allocation4 + $0x5]] }
  0x66   :  { %s111_s14 = sshll.u32 %s607_s13, 4  ;;  %s608_s16 = smov [#allocation5 + $0x5]   ;;  %s112_s14 = int_to_ptr.vmem [resolvable:$true] %s111_s14 }
  0x67   :  { %s132_s17 = sshll.u32 %s608_s16, 4  ;;  %s716_s18 = sld [smem:[#allocation4 + $0x6]]  ;;  %s719_s17 = int_to_ptr.vmem [resolvable:$true] %s132_s17 }
  0x68   :  { %s334_s19 = sshll.u32 %s706_s7, 4 }
  0x69   :  { %s101_s23 = scalar_lea.hbm %s790_s1, %s334_s19 }
  0x6a   :  { %s464_s25 = scalar_lea.hbm %s101_s23, 16  ;;  %p467_p13 = scmp.lt.u32.totalorder %s101_s23, %s790_s1 }
  0x6b   :  { %p465_p12 = scmp.ne.s32.totalorder %s101_s23, %s464_s25  ;;  %p468_p0 = scmp.lt.u32.totalorder %s657_s8, %s464_s25 }
  0x6c   :  { %p470_p2 = scmp.lt.u32.totalorder %s464_s25, %s101_s23 }
  0x6d   :  { %p469_p1 = por %p468_p0, %p467_p13 }
  0x6f   :  { %p471_p3 = por %p470_p2, %p469_p1 }
  0x71   :  { %p472_p4 = pnand %p471_p3, %p465_p12 }
  0x73   :  { %475 = shalt.err (!%p472_p4)  }
  0x74   :  { %s476_s29 = scalar_lea.vmem %s112_s14, 16  ;;  %p481_p6 = scmp.lt.s32.totalorder %s112_s14, %s640_s21 }
  0x75   :  { %p477_p5 = scmp.ne.s32.totalorder %s112_s14, %s476_s29  ;;  %p482_p7 = scmp.lt.s32.totalorder %s666_s12, %s476_s29 }
  0x77   :  { %p483_p8 = por %p482_p7, %p481_p6 }
  0x79   :  { %p484_p9 = pnand %p483_p8, %p477_p5 }
  0x7b   :  { %487 = shalt.err (!%p484_p9)  }
  0x7c   :  { %114 = dma.hbm_to_vmem [thread:$0]  %s101_s23, 16, %s112_s14, [#allocation2 + $0x4] }
  0x7d   :  { %s336_s30 = sshll.u32 %s714_s15, 4  ;;  %s609_s24 = smov [#allocation5 + $0x6]  }
  0x7e   :  { %s153_s27 = sshll.u32 %s609_s24, 4  ;;  %s122_s5 = scalar_lea.hbm %s790_s1, %s336_s30  ;;  %s734_s27 = int_to_ptr.vmem [resolvable:$true] %s153_s27 }
  0x7f   :  { %s488_s6 = scalar_lea.hbm %s122_s5, 16  ;;  %p491_p12 = scmp.lt.u32.totalorder %s122_s5, %s790_s1 }
  0x80   :  { %p489_p10 = scmp.ne.s32.totalorder %s122_s5, %s488_s6  ;;  %p492_p13 = scmp.lt.u32.totalorder %s657_s8, %s488_s6 }
  0x81   :  { %p494_p1 = scmp.lt.u32.totalorder %s488_s6, %s122_s5 }
  0x82   :  { %p493_p0 = por %p492_p13, %p491_p12 }
  0x84   :  { %p495_p2 = por %p494_p1, %p493_p0 }
  0x86   :  { %p496_p3 = pnand %p495_p2, %p489_p10 }
  0x88   :  { %499 = shalt.err (!%p496_p3)  }
  0x89   :  { %s500_s10 = scalar_lea.vmem %s719_s17, 16  ;;  %p505_p5 = scmp.lt.s32.totalorder %s719_s17, %s640_s21 }
  0x8a   :  { %p501_p4 = scmp.ne.s32.totalorder %s719_s17, %s500_s10  ;;  %p506_p6 = scmp.lt.s32.totalorder %s666_s12, %s500_s10 }
  0x8c   :  { %p507_p7 = por %p506_p6, %p505_p5 }
  0x8e   :  { %p508_p8 = pnand %p507_p7, %p501_p4 }
  0x90   :  { %511 = shalt.err (!%p508_p8)  }
  0x91   :  { %135 = dma.hbm_to_vmem [thread:$0]  %s122_s5, 16, %s719_s17, [#allocation2 + $0x5] }
  0x92   :  { %s338_s11 = sshll.u32 %s716_s18, 4  ;;  %s339_s0 = sld [smem:[#allocation4 + $0x7]] }
  0x93   :  { %s143_s15 = scalar_lea.hbm %s790_s1, %s338_s11 }
  0x94   :  { %s512_s16 = scalar_lea.hbm %s143_s15, 16  ;;  %p515_p10 = scmp.lt.u32.totalorder %s143_s15, %s790_s1 }
  0x95   :  { %p513_p9 = scmp.ne.s32.totalorder %s143_s15, %s512_s16  ;;  %p516_p12 = scmp.lt.u32.totalorder %s657_s8, %s512_s16 }
  0x96   :  { %p518_p0 = scmp.lt.u32.totalorder %s512_s16, %s143_s15 }
  0x97   :  { %p517_p13 = por %p516_p12, %p515_p10 }
  0x99   :  { %p519_p1 = por %p518_p0, %p517_p13 }
  0x9b   :  { %p520_p2 = pnand %p519_p1, %p513_p9 }
  0x9d   :  { %523 = shalt.err (!%p520_p2)  }
  0x9e   :  { %s524_s17 = scalar_lea.vmem %s734_s27, 16  ;;  %p529_p4 = scmp.lt.s32.totalorder %s734_s27, %s640_s21 }
  0x9f   :  { %p525_p3 = scmp.ne.s32.totalorder %s734_s27, %s524_s17  ;;  %p530_p5 = scmp.lt.s32.totalorder %s666_s12, %s524_s17 }
  0xa1   :  { %p531_p6 = por %p530_p5, %p529_p4 }
  0xa3   :  { %p532_p7 = pnand %p531_p6, %p525_p3 }
  0xa5   :  { %535 = shalt.err (!%p532_p7)  }
  0xa6   :  { %156 = dma.hbm_to_vmem [thread:$0]  %s143_s15, 16, %s734_s27, [#allocation2 + $0x6] }
  0xa7   :  { %s610_s18 = smov [#allocation5 + $0x7]   ;;  %s340_s23 = sshll.u32 %s339_s0, 4 }
  0xa8   :  { %s174_s22 = sshll.u32 %s610_s18, 4  ;;  %s164_s28 = scalar_lea.hbm %s790_s1, %s340_s23  ;;  %s175_s22 = int_to_ptr.vmem [resolvable:$true] %s174_s22 }
  0xa9   :  { %s536_s29 = scalar_lea.hbm %s164_s28, 16  ;;  %p539_p9 = scmp.lt.u32.totalorder %s164_s28, %s790_s1 }
  0xaa   :  { %p537_p8 = scmp.ne.s32.totalorder %s164_s28, %s536_s29  ;;  %p540_p10 = scmp.lt.u32.totalorder %s657_s8, %s536_s29 }
  0xab   :  { %p542_p13 = scmp.lt.u32.totalorder %s536_s29, %s164_s28 }
  0xac   :  { %p541_p12 = por %p540_p10, %p539_p9 }
  0xae   :  { %p543_p0 = por %p542_p13, %p541_p12 }
  0xb0   :  { %p544_p1 = pnand %p543_p0, %p537_p8 }
  0xb2   :  { %547 = shalt.err (!%p544_p1)  }
  0xb3   :  { %s548_s27 = scalar_lea.vmem %s175_s22, 16  ;;  %p553_p3 = scmp.lt.s32.totalorder %s175_s22, %s640_s21 }
  0xb4   :  { %p549_p2 = scmp.ne.s32.totalorder %s175_s22, %s548_s27  ;;  %p554_p4 = scmp.lt.s32.totalorder %s666_s12, %s548_s27 }
  0xb6   :  { %p555_p5 = por %p554_p4, %p553_p3 }
  0xb8   :  { %p556_p6 = pnand %p555_p5, %p549_p2 }
  0xba   :  { %559 = shalt.err (!%p556_p6)  }
  0xbb   :  { %177 = dma.hbm_to_vmem [thread:$0]  %s164_s28, 16, %s175_s22, [#allocation2 + $0x7] }
  0xbc   :  { %584 = dma.done.wait [#allocation2], 16 }
  0xbd   :  { %585 = vsyncadd [#allocation2], 4294967280 }
  0xbe   :  { %586 = dma.done.wait [#allocation2 + $0x1], 16 }
  0xbf   :  { %587 = vsyncadd [#allocation2 + $0x1], 4294967280 }
  0xc0   :  { %588 = dma.done.wait [#allocation2 + $0x2], 16 }
  0xc1   :  { %589 = vsyncadd [#allocation2 + $0x2], 4294967280 }
  0xc2   :  { %590 = dma.done.wait [#allocation2 + $0x3], 16 }
  0xc3   :  { %591 = vsyncadd [#allocation2 + $0x3], 4294967280 }
  0xc4   :  { %592 = dma.done.wait [#allocation2 + $0x4], 16 }
  0xc5   :  { %593 = vsyncadd [#allocation2 + $0x4], 4294967280 }
  0xc6   :  { %594 = dma.done.wait [#allocation2 + $0x5], 16 }
  0xc7   :  { %595 = vsyncadd [#allocation2 + $0x5], 4294967280 }
  0xc8   :  { %596 = dma.done.wait [#allocation2 + $0x6], 16 }
  0xc9   :  { %597 = vsyncadd [#allocation2 + $0x6], 4294967280 }
  0xca   :  { %598 = dma.done.wait [#allocation2 + $0x7], 16 }
  0xcb   :  { %599 = vsyncadd [#allocation2 + $0x7], 4294967280  ;;  %p561_p7 = scmp.ne.s32.totalorder %s640_s21, %s666_s12  ;;  %p566_p8 = scmp.lt.s32.totalorder %s666_s12, %s666_s12 }
  0xcd   :  { %p567_p9 = por %p566_p8, %p385_p11 }
  0xcf   :  { %p568_p10 = pnand %p567_p9, %p561_p7 }
  0xd1   :  { %571 = shalt.err (!%p568_p10)
}
  0xd2   :  { %s572_s3 = scalar_lea.hbm %s791_s2, 128 }
  0xd3   :  { %p573_p12 = scmp.ne.s32.totalorder %s791_s2, %s572_s3  ;;  %p576_p13 = scmp.lt.u32.totalorder %s572_s3, %s791_s2 }
  0xd5   :  { %p578_p0 = pnand %p576_p13, %p573_p12 }
  0xd7   :  { %581 = shalt.err (!%p578_p0)
}
  0xd8   :  { %250 = dma.vmem_to_hbm [thread:$0]  %s640_s21, 128, %s791_s2, [#allocation6]  }
  0xd9   :  { %600 = dma.done.wait [#allocation6], 128  }
  0xda   :  { %601 = vsyncadd [#allocation6], 4294967168 }
  0xdb   :  { %254 = vsyncpa [#allocation6], 1 }
  0xdc   :  { %255 = vsyncmov [#allocation2] }
  0xdf   :  { %s256_s10 = vpop.sfrf %255 }
  0xe0   :  { %p341_p11 = scmp.ne.s32.totalorder %s256_s10, 0 }
  0xe2   :  { %260 = shalt.err (%p341_p11)  }
  0xe3   :  { %262 = vsyncmov [#allocation2 + $0x1] }
  0xe6   :  { %s263_s11 = vpop.sfrf %262 }
  0xe7   :  { %p342_p1 = scmp.ne.s32.totalorder %s263_s11, 0 }
  0xe9   :  { %267 = shalt.err (%p342_p1)  }
  0xea   :  { %269 = vsyncmov [#allocation2 + $0x2] }
  0xed   :  { %s270_s0 = vpop.sfrf %269 }
  0xee   :  { %p343_p2 = scmp.ne.s32.totalorder %s270_s0, 0 }
  0xf0   :  { %274 = shalt.err (%p343_p2)  }
  0xf1   :  { %276 = vsyncmov [#allocation2 + $0x3] }
  0xf4   :  { %s277_s13 = vpop.sfrf %276 }
  0xf5   :  { %p344_p3 = scmp.ne.s32.totalorder %s277_s13, 0 }
  0xf7   :  { %281 = shalt.err (%p344_p3)  }
  0xf8   :  { %283 = vsyncmov [#allocation2 + $0x4] }
  0xfb   :  { %s284_s2 = vpop.sfrf %283 }
  0xfc   :  { %p345_p4 = scmp.ne.s32.totalorder %s284_s2, 0 }
  0xfe   :  { %288 = shalt.err (%p345_p4)  }
  0xff   :  { %290 = vsyncmov [#allocation2 + $0x5] }
 0x102   :  { %s291_s21 = vpop.sfrf %290 }
 0x103   :  { %p346_p5 = scmp.ne.s32.totalorder %s291_s21, 0 }
 0x105   :  { %295 = shalt.err (%p346_p5)  }
 0x106   :  { %297 = vsyncmov [#allocation2 + $0x6] }
 0x109   :  { %s298_s14 = vpop.sfrf %297 }
 0x10a   :  { %p347_p6 = scmp.ne.s32.totalorder %s298_s14, 0 }
 0x10c   :  { %302 = shalt.err (%p347_p6)  }
 0x10d   :  { %304 = vsyncmov [#allocation2 + $0x7] }
 0x110   :  { %s305_s15 = vpop.sfrf %304 }
 0x111   :  { %p348_p7 = scmp.ne.s32.totalorder %s305_s15, 0 }
 0x113   :  { %309 = shalt.err (%p348_p7)  }

</bundles_post_ra>
